<compile_context>
chip_gen: v5e
topology: v5e:2x2
jax: 0.10.0
libtpu: 0.0.40
codegen_flags: <defaults>
</compile_context>

<pallas_src>
import functools

import jax
import jax.numpy as jnp
from jax import lax
from jax.experimental import pallas as pl
from jax.experimental.pallas import tpu as pltpu

KERNEL = 3  # MaxPool2d(kernel_size=3) -> stride=3, padding=0; ceil_mode=False -> floor dims


def _maxpool_block_kernel(x_ref, o_ref, col_ref, *, ho, wo):
    """Max-pools a whole (tile_p, H, W) block into (tile_p, Ho, Wo) in one shot.

    x_ref:   (tile_p, H, W)    input block (auto double-buffered by BlockSpec)
    o_ref:   (tile_p, Ho, Wo)  output block
    col_ref: (tile_p, W, Ho)   VMEM scratch (input dtype): batched-transpose target so the
                               column direction can also use sublane-strided loads.
    """
    k = KERNEL

    # ---- Row direction: block-wide stride-3 sublane-strided loads at window offsets 0/1/2,
    # reduced with a plain VPU maximum tree (no XLU axis reduction).  Rows >= 3*Ho are never
    # read, so ceil_mode=False cropping needs no host copy.
    # TODO(synk): sub-32-bit dtypes go through packed sublane-strided loads; upcast on the
    # host if a packed dtype ever fails to lower.
    r0 = x_ref[:, pl.ds(0, ho, k), :]
    r1 = x_ref[:, pl.ds(1, ho, k), :]
    r2 = x_ref[:, pl.ds(2, ho, k), :]
    rm = jnp.maximum(jnp.maximum(r0, r1), r2)              # (tile_p, Ho, W)

    # ---- Column direction: ONE batched minor-dims transpose (XLU, otherwise idle) through
    # the VMEM scratch so W sits on the sublane axis, then the same stride-3 sublane loads +
    # VPU max tree.  Columns >= 3*Wo are never used.  Exactly one scratch store and one
    # output store per grid step.
    col_ref[...] = jnp.swapaxes(rm, 1, 2)                  # (tile_p, W, Ho)
    c0 = col_ref[:, pl.ds(0, wo, k), :]
    c1 = col_ref[:, pl.ds(1, wo, k), :]
    c2 = col_ref[:, pl.ds(2, wo, k), :]
    cm = jnp.maximum(jnp.maximum(c0, c1), c2)              # (tile_p, Wo, Ho)

    o_ref[...] = jnp.swapaxes(cm, 1, 2).astype(o_ref.dtype)  # single block-wide store


def _pick_tile_p(p, per_plane_bytes, budget_bytes):
    """Largest plane-tile whose full footprint (2x input block + 2x output block + scratch)
    fits the VMEM budget, capped so the parallel grid has >= 4 steps when p >= 4
    (>= 2 steps per v7x TensorCore so BlockSpec double-buffering has work to overlap)."""
    if p >= 4:
        cap = p // 4
    elif p >= 2:
        cap = p // 2
    else:
        cap = 1
    fit = budget_bytes // max(1, per_plane_bytes)
    return max(1, min(cap, fit))


def pumbaa_forward(x, *, vmem_block_budget_bytes=24 * 1024 * 1024,
                   vmem_limit_bytes=32 * 1024 * 1024):
    """MaxPool2d(kernel_size=3, stride=3, padding=0, ceil_mode=False) on NCHW input."""
    n, c, h, w = x.shape
    k = KERNEL
    ho, wo = h // k, w // k                      # ceil_mode=False -> floor output dims
    p = n * c
    if p == 0 or ho == 0 or wo == 0:             # degenerate batch/channel/spatial dims
        return jnp.zeros((n, c, ho, wo), dtype=x.dtype)

    xp = x.reshape(p, h, w)                      # free reshape: no HBM copy, no transpose

    itemsize = x.dtype.itemsize
    pad = lambda v, m: -(-v // m) * m            # (8,128) tiling/padding of VMEM blocks
    in_plane = pad(h, 8) * pad(w, 128) * itemsize       # double-buffered by BlockSpec
    out_plane = pad(ho, 8) * pad(wo, 128) * itemsize    # double-buffered by BlockSpec
    scr_plane = pad(w, 8) * pad(ho, 128) * itemsize     # single-buffered scratch
    per_plane = 2 * in_plane + 2 * out_plane + scr_plane
    tile_p = _pick_tile_p(p, per_plane, vmem_block_budget_bytes)
    grid = (pl.cdiv(p, tile_p),)                 # ragged last block: OOB writes are dropped

    out_bytes = p * ho * wo * itemsize
    cost = pl.CostEstimate(
        flops=8 * p * ho * wo,                   # 8 comparisons per output element
        transcendentals=0,
        bytes_accessed=x.size * itemsize + out_bytes,
    )

    kernel = functools.partial(_maxpool_block_kernel, ho=ho, wo=wo)
    out = pl.pallas_call(
        kernel,
        out_shape=jax.ShapeDtypeStruct((p, ho, wo), x.dtype),
        grid_spec=pltpu.PrefetchScalarGridSpec(
            num_scalar_prefetch=0,
            grid=grid,
            in_specs=[pl.BlockSpec((tile_p, h, w), lambda i: (i, 0, 0))],
            out_specs=pl.BlockSpec((tile_p, ho, wo), lambda i: (i, 0, 0)),
            scratch_shapes=[pltpu.VMEM((tile_p, w, ho), x.dtype)],
        ),
        compiler_params=pltpu.CompilerParams(
            dimension_semantics=("parallel",),   # plane tiles are independent -> megacore
            vmem_limit_bytes=vmem_limit_bytes,   # raise scoped VMEM so big tiles compile
        ),
        cost_estimate=cost,
    )(xp)
    return out.reshape(n, c, ho, wo)             # free reshape back to NCHW


if __name__ == "__main__":
    key = jax.random.PRNGKey(0)
    # NCHW input, matching the PyTorch module's expected layout.
    x = jax.random.normal(key, (2, 4, 16, 16), dtype=jnp.float32)

    out = jax.block_until_ready(pumbaa_forward(x))

    # Reference check (pure JAX) for the same max-pool semantics.
    ref = lax.reduce_window(
        x, -jnp.inf, lax.max,
        window_dimensions=(1, 1, 3, 3),
        window_strides=(1, 1, 3, 3),
        padding="VALID",
    )
    assert out.shape == (2, 4, 5, 5), out.shape
    assert out.dtype == x.dtype
    assert jnp.array_equal(out, ref), "mismatch vs reference max-pool"

    print("KERNEL_OK")
</pallas_src>

<mosaic_0001>
module attributes {stable_mosaic.version = 11 : i64} {
  func.func @_maxpool_block_kernel(%arg0: i32, %arg1: memref<2x16x16xf32, #tpu.memory_space<vmem>>, %arg2: memref<2x5x5xf32, #tpu.memory_space<vmem>>, %arg3: memref<2x16x5xf32, #tpu.memory_space<vmem>>) attributes {dimension_semantics = [#tpu.dimension_semantics<parallel>], iteration_bounds = array<i64: 4>, scalar_prefetch = 0 : i64, scratch_operands = 1 : i64, tpu.core_type = #tpu.core_type<tc>, window_params = [{transform_indices = @transform_0, window_bounds = array<i64: 2, 16, 16>}, {transform_indices = @transform_1, window_bounds = array<i64: 2, 5, 5>}]} {
    %c0 = arith.constant 0 : index
    %c0_0 = arith.constant 0 : index
    %c0_1 = arith.constant 0 : index
    %0 = tpu.strided_load %arg1[%c0, %c0_0, %c0_1] {strides = array<i32: 1, 3, 1>} : memref<2x16x16xf32, #tpu.memory_space<vmem>>, vector<2x5x16xf32>
    %c0_2 = arith.constant 0 : index
    %c1 = arith.constant 1 : index
    %c0_3 = arith.constant 0 : index
    %1 = tpu.strided_load %arg1[%c0_2, %c1, %c0_3] {strides = array<i32: 1, 3, 1>} : memref<2x16x16xf32, #tpu.memory_space<vmem>>, vector<2x5x16xf32>
    %c0_4 = arith.constant 0 : index
    %c2 = arith.constant 2 : index
    %c0_5 = arith.constant 0 : index
    %2 = tpu.strided_load %arg1[%c0_4, %c2, %c0_5] {strides = array<i32: 1, 3, 1>} : memref<2x16x16xf32, #tpu.memory_space<vmem>>, vector<2x5x16xf32>
    %3 = arith.maximumf %0, %1 : vector<2x5x16xf32>
    %4 = arith.maximumf %3, %2 : vector<2x5x16xf32>
    %5 = tpu.transpose %4, [0, 2, 1] : vector<2x5x16xf32> -> vector<2x16x5xf32>
    %c0_6 = arith.constant 0 : index
    %c0_7 = arith.constant 0 : index
    %c0_8 = arith.constant 0 : index
    %6 = vector.load %arg3[%c0_6, %c0_7, %c0_8] : memref<2x16x5xf32, #tpu.memory_space<vmem>>, vector<2x16x5xf32>
    tpu.vector_store %arg3[%c0_6, %c0_7, %c0_8], %5 {strides = array<i32>} : memref<2x16x5xf32, #tpu.memory_space<vmem>>, vector<2x16x5xf32>,
    %c0_9 = arith.constant 0 : index
    %c0_10 = arith.constant 0 : index
    %c0_11 = arith.constant 0 : index
    %7 = tpu.strided_load %arg3[%c0_9, %c0_10, %c0_11] {strides = array<i32: 1, 3, 1>} : memref<2x16x5xf32, #tpu.memory_space<vmem>>, vector<2x5x5xf32>
    %c0_12 = arith.constant 0 : index
    %c1_13 = arith.constant 1 : index
    %c0_14 = arith.constant 0 : index
    %8 = tpu.strided_load %arg3[%c0_12, %c1_13, %c0_14] {strides = array<i32: 1, 3, 1>} : memref<2x16x5xf32, #tpu.memory_space<vmem>>, vector<2x5x5xf32>
    %c0_15 = arith.constant 0 : index
    %c2_16 = arith.constant 2 : index
    %c0_17 = arith.constant 0 : index
    %9 = tpu.strided_load %arg3[%c0_15, %c2_16, %c0_17] {strides = array<i32: 1, 3, 1>} : memref<2x16x5xf32, #tpu.memory_space<vmem>>, vector<2x5x5xf32>
    %10 = arith.maximumf %7, %8 : vector<2x5x5xf32>
    %11 = arith.maximumf %10, %9 : vector<2x5x5xf32>
    %12 = tpu.transpose %11, [0, 2, 1] : vector<2x5x5xf32> -> vector<2x5x5xf32>
    %c0_18 = arith.constant 0 : index
    %c0_19 = arith.constant 0 : index
    %c0_20 = arith.constant 0 : index
    %13 = vector.load %arg2[%c0_18, %c0_19, %c0_20] : memref<2x5x5xf32, #tpu.memory_space<vmem>>, vector<2x5x5xf32>
    tpu.vector_store %arg2[%c0_18, %c0_19, %c0_20], %12 {strides = array<i32>} : memref<2x5x5xf32, #tpu.memory_space<vmem>>, vector<2x5x5xf32>,
    return
  }
  func.func @transform_0(%arg0: i32) -> (i32, i32, i32) {
    %c0_i32 = arith.constant 0 : i32
    %c0_i32_0 = arith.constant 0 : i32
    %c0_i32_1 = arith.constant 0 : i32
    return %arg0, %c0_i32, %c0_i32_0 : i32, i32, i32
  }
  func.func @transform_1(%arg0: i32) -> (i32, i32, i32) {
    %c0_i32 = arith.constant 0 : i32
    %c0_i32_0 = arith.constant 0 : i32
    %c0_i32_1 = arith.constant 0 : i32
    return %arg0, %c0_i32, %c0_i32_0 : i32, i32, i32
  }
}

</mosaic_0001>

<bundles_post_ra>
// kernel: tpu_custom_call.1
= control target key start
LH: loop header
LB: loop body
LE: loop exit
PB: predicated region body
PF: predicated region fallthrough
CT: control target
= control target key end

     0   :  { %6 = vsyncpa [#allocation4], 0  ;;  %s607_s0 = inlined_call_operand.hbm [shape: f32[8,16,16], index: 0, kind: input, shape index: {}]   ;;  %s608_s1 = inlined_call_operand.vmem [shape: f32[8,5,5], index: 1, kind: output, shape index: {}]  }
   0x1   :  { %8 = vsyncpa [#allocation4 + $0x1], 0  ;;  %s516_s6 = smov 0   ;;  %s518_s7 = smov 0  }
   0x2   :  { %s520_s8 = smov 0   ;;  %s522_s9 = smov 0  }
   0x3 LB: > { %s375_s10 = sadd.s32 4294967295, %s502_s9   ;;  %s536_s11 = sadd.s32 1, %s502_s9   ;;  %s502_s9 = sphi %s522_s9, %s615_s9   ;;  %s498_s8 = sphi %s520_s8, %s614_s8   ;;  %s494_s7 = sphi %s518_s7, %s613_s7   ;;  %s490_s6 = sphi %s516_s6, %s612_s6  }
   0x4   : > { %s18_s12 = ssub.s32 %s502_s9, %s536_s11  ;;  %s21_s13 = sadd.s32 1, %s498_s8 }
   0x5   : > { %p19_p0 = scmp.eq.s32.totalorder %s18_s12, 0  ;;  %p28_p1 = scmp.ne.s32.totalorder %s498_s8, %s494_s7 }
   0x6   : > { %p29_p2 = scmp.eq.s32.totalorder %s502_s9, 0  ;;  %p34_p3 = scmp.ne.s32.totalorder %s494_s7, %s490_s6 }
   0x7   : > { %s546_s14 = scalar_select %p19_p0, %s498_s8, %s21_s13  }
   0x8   : > { %p548_p4 = por %p29_p2, %p28_p1  ;;  %p35_p5 = scmp.eq.s32.totalorder %s375_s10, 0 }
   0x9   : > { %p402_p6 = scmp.lt.s32.totalorder %s502_s9, 4  ;;  %s84_s17 = sand.u32 1, %s498_s8  }
   0xa   : > { %p555_p7 = por %p35_p5, %p34_p3  ;;  %s379_s18 = sshll.u32 %s84_s17, 5 }
   0xb   : > { %s395_s19 = sshll.u32 %s502_s9, 5  ;;  %s88_s23 = scalar_lea.vmem [#allocation3], %s379_s18 }
   0xc   : > { %s94_s22 = scalar_lea.hbm %s607_s0, %s395_s19  ;;  %s97_s24 = sshll.u32 %s88_s23, 4  ;;  %s98_s24 = int_to_ptr.vmem [resolvable:$true] %s97_s24 }
   0xd   : > { %s95_s25 = sshll.u32 %s94_s22, 4  ;;  %p566_p8 = pnand %p402_p6, %p548_p4  ;;  %s96_s25 = int_to_ptr.hbm [resolvable:$true] %s95_s25 }
   0xe   : > { %p383_p9 = scmp.ge.s32.totalorder %s502_s9, 1  ;;  %s85_s27 = scalar_lea.sflag [#allocation4], %s84_s17 }
   0xf   : > { %s438_s28 = sshra.s32 %s96_s25, 4  ;;  %p442_p11 = pneg %p566_p8  ;;  %s439_s28 = int_to_ptr.hbm [resolvable:$true] %s438_s28 }
  0x10   : > { %s440_s29 = scalar_lea.hbm %s439_s28, 32  ;;  %s445_s3 = scalar_lea.hbm %s607_s0, 128 }
  0x11   : > { %p441_p10 = scmp.ne.s32.totalorder %s439_s28, %s440_s29  ;;  %p446_p0 = scmp.lt.s32.totalorder %s439_s28, %s607_s0 }
  0x12   : > { %p447_p1 = scmp.lt.s32.totalorder %s445_s3, %s440_s29 }
  0x13   : > { %p443_p12 = pnand %p442_p11, %p441_p10 }
  0x14   : > { %p448_p2 = por %p447_p1, %p446_p0 }
  0x15   : > { %p444_p13 = pneg %p443_p12 }
  0x17   : > { %p449_p3 = pnand %p448_p2, %p444_p13 }
  0x19   : > { %452 = shalt.err (!%p449_p3)
}
  0x1a   : > { %s504_s6 = smov 128   ;;  %s505_s12 = smov 8  }
  0x1b   : > { %401 = dma.hbm_to_vmem [thread:$0]  (!%p566_p8), %s96_s25, 512, %s98_s24, %s85_s27, %s504_s6, %s504_s6, %s505_s12  }
  0x1c   : > { %p105_p4 = scmp.lt.s32.totalorder %s502_s9, 5 }
  0x1e   : > { %p106_p5 = pnand %p383_p9, %p105_p4 }
  0x1f   : > { %s111_s13 = sand.u32 (!%p106_p5), 1, %s494_s7  }
  0x20   : > { %109 = sbr.rel (%p106_p5) target bundleno = 411 (0x19b), region = 24  ;;  %s384_s15 = sshll.u32 (!%p106_p5), %s111_s13, 5 }
  0x21   : > { %s112_s17 = scalar_lea.sflag (!%p106_p5), [#allocation4], %s111_s13  ;;  %s115_s18 = scalar_lea.vmem (!%p106_p5), [#allocation3], %s384_s15 }
  0x25   : > { %485 = dma.done.wait (%p555_p7), %s112_s17, 512  }
  0x26   : > { %487 = vsyncadd (%p555_p7), %s112_s17, 4294966784  ;;  %v142_v0 = vld [vmem:[%s115_s18] ss:$3 sm:$0x1f]  ;;  %vm221_vm0 = vcmask 39936   ;;  %s385_s16 = sshll.u32 %s375_s10, 1 }
  0x27   : > { %v388_v1 = vld [vmem:[%s115_s18 + $0x1] ss:$3 sm:$0x1f]  ;;  %v390_v2 = vld [vmem:[%s115_s18 + $0x2] ss:$3 sm:$0x1f] }
  0x28   : > { %v153_v3 = vmax.f32 %v142_v0, %v388_v1  ;;  %v387_v5 = vld [vmem:[%s115_s18 + $0x10] ss:$3 sm:$0x1f]  ;;  %v389_v6 = vld [vmem:[%s115_s18 + $0x11] ss:$3 sm:$0x1f] }
  0x29   : > { %v154_v7 = vmax.f32 %v387_v5, %v389_v6  ;;  %v391_v8 = vld [vmem:[%s115_s18 + $0x12] ss:$3 sm:$0x1f]  ;;  %p137_p6 = scmp.lt.s32.totalorder %s385_s16, 7  ;;  %vm305_vm1 = vcmask 36864  }
  0x2a   : > { %v155_v4 = vmax.f32 %v153_v3, %v390_v2 }
  0x2b   : > { %v156_v9 = vmax.f32 %v154_v7, %v391_v8  ;;  %s617_s16 = smov (!%p137_p6, %s385_s16), 7 }
  0x2c   : > { %157 = vxpose.xlu0.b32.start.end [1/1] (short) (narrow) %v155_v4, 16  ;;  %s386_s19 = sshll.u32 %s617_s16, 3 }
  0x2d   : > { %s140_s22 = scalar_lea.vmem %s608_s1, %s386_s19 }
  0x3c   : > { %189 = vxpose.xlu0.b32.start.end [1/1] (short) (narrow) %v156_v9, 16 }
  0xd0   : > { %v173_v10 = vpop.trf.xlu0 }
  0xd1   : > { %222 = vst.msk [vmem:[#allocation2] sm:$0xff] %vm221_vm0, %v173_v10 }
  0xd8   : > { %v174_v11 = vpop.trf.xlu0 }
  0xd9   : > { %223 = vst.msk [vmem:[#allocation2 + $0x8] sm:$0xff] %vm221_vm0, %v174_v11 }
  0xe0   : > { %v205_v12 = vpop.trf.xlu0  ;;  %v226_v13 = vld [vmem:[#allocation2] ss:$3 sm:$0x1f]  ;;  %v230_v14 = vld [vmem:[#allocation2 + $0x1] ss:$3 sm:$0x1f] }
  0xe1   : > { %224 = vst.msk [vmem:[#allocation2 + $0x10] sm:$0xff] %vm221_vm0, %v205_v12  ;;  %v237_v15 = vmax.f32 %v226_v13, %v230_v14  ;;  %v234_v16 = vld [vmem:[#allocation2 + $0x2] ss:$3 sm:$0x1f] }
  0xe3   : > { %v239_v17 = vmax.f32 %v237_v15, %v234_v16 }
  0xe5   : > { %241 = vxpose.xlu1.b32.start.end [1/1] (short) (narrow) %v239_v17, 8 }
  0xe8   : > { %v206_v18 = vpop.trf.xlu0 }
  0xe9   : > { %225 = vst.msk [vmem:[#allocation2 + $0x18] sm:$0xff] %vm221_vm0, %v206_v18 }
  0xf0   : > { %v228_v19 = vld [vmem:[#allocation2 + $0x10] ss:$3 sm:$0x1f]  ;;  %v232_v20 = vld [vmem:[#allocation2 + $0x11] ss:$3 sm:$0x1f] }
  0xf1   : > { %v238_v21 = vmax.f32 %v228_v19, %v232_v20  ;;  %v236_v22 = vld [vmem:[#allocation2 + $0x12] ss:$3 sm:$0x1f] }
  0xf3   : > { %v240_v23 = vmax.f32 %v238_v21, %v236_v22 }
  0xf5   : > { %273 = vxpose.xlu1.b32.start.end [1/1] (short) (narrow) %v240_v23, 8 }
 0x189   : > { %v257_v24 = vpop.trf.xlu1 }
 0x18a   : > { %306 = vst.msk [vmem:[%s140_s22] sm:$0x1f] %vm305_vm1, %v257_v24 }
 0x199   : > { %v289_v25 = vpop.trf.xlu1 }
 0x19a   : > { %307 = vst.msk [vmem:[%s140_s22 + $0x8] sm:$0x1f] %vm305_vm1, %v289_v25 }
 0x19b PF: > { %p11_p7 = scmp.ge.s32.totalorder %s536_s11, 6   ;;  %s612_s6 = smov %s494_s7 }
 0x19c   : > { %s613_s7 = smov %s498_s8  ;;  %s614_s8 = smov %s546_s14 }
 0x19d   : > { %s615_s9 = smov %s536_s11  ;;  %13 = sbr.rel (!%p11_p7) target bundleno = 3 (0x3), region = 74 }
 0x1a2   :  { %330 = vsyncpa [#allocation4], 1 }
 0x1a3   :  { %332 = vsyncpa [#allocation4 + $0x1], 1 }

</bundles_post_ra>
